<compile_context>
chip_gen: v6e
topology: v6e:2x2x1
jax: 0.10.0
libtpu: 0.0.40
codegen_flags: <defaults>
</compile_context>

<pallas_src>
import jax
import jax.numpy as jnp
from jax.experimental import pallas as pl
from jax.experimental.pallas import tpu as pltpu


_LANE = 128          # lane (last-dim) granularity
_SUBLANE_BF16 = 16   # second-minor granularity for bf16 operands
_NEG_INF = float("-inf")


def _round_up(x, m):
    return (x + m - 1) // m * m


def speaker_id_kernel(x_ref, w_ref, b_ref, o_ref):
    """One batch tile: logits = x @ W + b, then log_softmax over classes.

    x_ref: (bm, Dpad)   bf16   batch tile of inputs
    w_ref: (Dpad, Npad) bf16   grid-invariant weight slab (PyTorch weight^T, padded)
    b_ref: (1, Npad)    f32    bias; padded class columns are -inf
    o_ref: (bm, Npad)   f32    log-probs (padded columns come out -inf)
    """
    # MXU matmul, f32 accumulation; bias add + softmax in f32 (VPU/EUP).
    logits = jnp.dot(x_ref[...], w_ref[...],
                     preferred_element_type=jnp.float32) + b_ref[...]
    # Numerically-stable log_softmax along the class axis (PyTorch dim=1).
    # Padded columns are -inf: ignored by max, exp(-inf)=0 in the sum.
    m = jnp.max(logits, axis=-1, keepdims=True)
    shifted = logits - m
    lse = jnp.log(jnp.sum(jnp.exp(shifted), axis=-1, keepdims=True))
    o_ref[...] = (shifted - lse).astype(o_ref.dtype)


def speaker_id_predictor(x, w, b, *, block_batch=None,
                         compute_dtype=jnp.bfloat16,
                         vmem_budget_bytes=48 * 1024 * 1024):
    """x: (B, D) f32.  w: (D, N) = transposed PyTorch nn.Linear weight.  b: (N,).

    Returns (B, N) float32 log-probabilities == F.log_softmax(Linear(x), dim=1).
    """
    B, D = x.shape
    Dw, N = w.shape
    assert Dw == D, "weight must be given transposed: (input_dim, num_speaker_ids)"

    # ---- lane-dense padding of feature / class dims ------------------------
    Dpad = _round_up(D, _LANE)
    Npad = _round_up(N, _LANE)

    # ---- batch tile: big enough to amortize ~0.35us/step and pipeline ------
    bm = 512 if block_batch is None else block_batch
    bm = _round_up(min(bm, _round_up(B, _SUBLANE_BF16)), _SUBLANE_BF16)

    itemsize = jnp.dtype(compute_dtype).itemsize

    def footprint(bm_):
        # x tile (double-buffered, bf16) + out tile (double-buffered, f32)
        # + weight slab (grid-invariant; budget 2x worst case) + bias.
        return (2 * bm_ * Dpad * itemsize
                + 2 * bm_ * Npad * 4
                + 2 * Dpad * Npad * itemsize
                + 2 * Npad * 4)

    while bm > _SUBLANE_BF16 and footprint(bm) > vmem_budget_bytes:
        bm = max(_SUBLANE_BF16, _round_up(bm // 2, _SUBLANE_BF16))
    # TODO(synk): for very large D*N (e.g. v7x with 64 MiB VMEM and tens of
    # thousands of speakers) add a K-reduction grid axis over D plus an
    # online-softmax N tiling instead of keeping the whole weight resident.

    Bpad = _round_up(B, bm)
    grid = (Bpad // bm,)

    vmem_limit = int(min(max(2 * footprint(bm), 32 * 1024 * 1024),
                         64 * 1024 * 1024))

    # ---- padded operands ----------------------------------------------------
    x_p = jnp.zeros((Bpad, Dpad), compute_dtype).at[:B, :D].set(
        x.astype(compute_dtype))
    w_p = jnp.zeros((Dpad, Npad), compute_dtype).at[:D, :N].set(
        w.astype(compute_dtype))
    # -inf bias on padded class columns keeps the log-sum-exp exact.
    b_p = jnp.full((1, Npad), _NEG_INF, jnp.float32).at[0, :N].set(
        b.astype(jnp.float32))

    cost = pl.CostEstimate(
        flops=2 * Bpad * Dpad * Npad,
        transcendentals=Bpad * Npad,                      # exp in the softmax
        bytes_accessed=(x_p.size * itemsize + w_p.size * itemsize
                        + b_p.size * 4 + Bpad * Npad * 4),
    )

    out = pl.pallas_call(
        speaker_id_kernel,
        out_shape=jax.ShapeDtypeStruct((Bpad, Npad), jnp.float32),
        grid_spec=pltpu.PrefetchScalarGridSpec(
            num_scalar_prefetch=0,
            grid=grid,
            in_specs=[
                pl.BlockSpec((bm, Dpad), lambda i: (i, 0)),
                # Grid-invariant index_map: W is fetched once and kept resident
                # across batch tiles (effectively single-buffered).
                pl.BlockSpec((Dpad, Npad), lambda i: (0, 0)),
                pl.BlockSpec((1, Npad), lambda i: (0, 0)),
            ],
            out_specs=pl.BlockSpec((bm, Npad), lambda i: (i, 0)),
        ),
        compiler_params=pltpu.CompilerParams(
            dimension_semantics=("parallel",),
            vmem_limit_bytes=vmem_limit,
        ),
        cost_estimate=cost,
    )(x_p, w_p, b_p)

    # Drop batch padding rows and -inf padded class columns.
    return out[:B, :N]


def reference_bf16(x, w, b):
    """Reference using the same bf16 MXU operands / f32 accumulation."""
    logits = jnp.dot(x.astype(jnp.bfloat16), w.astype(jnp.bfloat16),
                     preferred_element_type=jnp.float32) + b[None, :]
    return jax.nn.log_softmax(logits, axis=1)


def reference_f32(x, w, b):
    return jax.nn.log_softmax(x @ w + b[None, :], axis=1)


if __name__ == "__main__":
    batch = 8
    input_dim = 32
    num_speaker_ids = 16

    key = jax.random.PRNGKey(0)
    kx, kw, kb = jax.random.split(key, 3)

    # Deterministic parameter init (uniform, akin to nn.Linear default range).
    bound = 1.0 / (input_dim ** 0.5)
    w = jax.random.uniform(kw, (input_dim, num_speaker_ids),
                           minval=-bound, maxval=bound, dtype=jnp.float32)
    b = jax.random.uniform(kb, (num_speaker_ids,),
                           minval=-bound, maxval=bound, dtype=jnp.float32)
    x = jax.random.normal(kx, (batch, input_dim), dtype=jnp.float32)

    out = speaker_id_predictor(x, w, b)
    out = jax.block_until_ready(out)

    assert out.shape == (batch, num_speaker_ids)
    assert bool(jnp.all(jnp.isfinite(out)))
    # Tight check against a reference using identical bf16 MXU operands.
    assert jnp.allclose(out, reference_bf16(x, w, b), atol=1e-4, rtol=1e-4)
    # Loose check against the full-precision reference (bf16 cast error only).
    assert jnp.allclose(out, reference_f32(x, w, b), atol=5e-2, rtol=5e-2)

    print("KERNEL_OK")
</pallas_src>

<mosaic_0001>
module attributes {stable_mosaic.version = 11 : i64} {
  func.func @speaker_id_kernel(%arg0: i32, %arg1: memref<16x128xbf16, #tpu.memory_space<vmem>>, %arg2: memref<128x128xbf16, #tpu.memory_space<vmem>>, %arg3: memref<1x128xf32, #tpu.memory_space<vmem>>, %arg4: memref<16x128xf32, #tpu.memory_space<vmem>>) attributes {dimension_semantics = [#tpu.dimension_semantics<parallel>], iteration_bounds = array<i64: 1>, scalar_prefetch = 0 : i64, scratch_operands = 0 : i64, tpu.core_type = #tpu.core_type<tc>, window_params = [{transform_indices = @transform_0, window_bounds = array<i64: 16, 128>}, {pipeline_mode = #tpu.pipeline_mode<synchronous>, transform_indices = @transform_1, window_bounds = array<i64: 128, 128>}, {pipeline_mode = #tpu.pipeline_mode<synchronous>, transform_indices = @transform_2, window_bounds = array<i64: 1, 128>}, {transform_indices = @transform_3, window_bounds = array<i64: 16, 128>}]} {
    %c0 = arith.constant 0 : index
    %c0_0 = arith.constant 0 : index
    %0 = vector.load %arg1[%c0, %c0_0] : memref<16x128xbf16, #tpu.memory_space<vmem>>, vector<16x128xbf16>
    %c0_1 = arith.constant 0 : index
    %c0_2 = arith.constant 0 : index
    %1 = vector.load %arg2[%c0_1, %c0_2] : memref<128x128xbf16, #tpu.memory_space<vmem>>, vector<128x128xbf16>
    %cst = arith.constant dense<0.000000e+00> : vector<16x128xf32>
    %2 = tpu.matmul %0, %1, %cst {dimension_numbers = #tpu.dot_dimension_numbers<[1], [0], [0], [1], [0, 0, 1, 1], [], []>} : vector<16x128xbf16>, vector<128x128xbf16>, vector<16x128xf32> -> vector<16x128xf32>
    %c0_3 = arith.constant 0 : index
    %c0_4 = arith.constant 0 : index
    %3 = vector.load %arg3[%c0_3, %c0_4] : memref<1x128xf32, #tpu.memory_space<vmem>>, vector<1x128xf32>
    %4 = vector.broadcast %3 : vector<1x128xf32> to vector<16x128xf32>
    %5 = arith.addf %2, %4 : vector<16x128xf32>
    %cst_5 = arith.constant dense<0xFF800000> : vector<16xf32>
    %6 = vector.multi_reduction <maximumf>, %5, %cst_5 [1] : vector<16x128xf32> to vector<16xf32>
    %7 = vector.shape_cast %6 : vector<16xf32> to vector<16x1xf32>
    %8 = vector.broadcast %7 : vector<16x1xf32> to vector<16x128xf32>
    %9 = arith.subf %5, %8 : vector<16x128xf32>
    %10 = math.exp %9 : vector<16x128xf32>
    %cst_6 = arith.constant dense<0.000000e+00> : vector<16xf32>
    %11 = vector.multi_reduction <add>, %10, %cst_6 [1] : vector<16x128xf32> to vector<16xf32>
    %12 = vector.shape_cast %11 : vector<16xf32> to vector<16x1xf32>
    %13 = math.log %12 : vector<16x1xf32>
    %14 = vector.broadcast %13 : vector<16x1xf32> to vector<16x128xf32>
    %15 = arith.subf %9, %14 : vector<16x128xf32>
    %c0_7 = arith.constant 0 : index
    %c0_8 = arith.constant 0 : index
    %16 = vector.load %arg4[%c0_7, %c0_8] : memref<16x128xf32, #tpu.memory_space<vmem>>, vector<16x128xf32>
    tpu.vector_store %arg4[%c0_7, %c0_8], %15 {strides = array<i32>} : memref<16x128xf32, #tpu.memory_space<vmem>>, vector<16x128xf32>,
    return
  }
  func.func @transform_0(%arg0: i32) -> (i32, i32) {
    %c0_i32 = arith.constant 0 : i32
    %c0_i32_0 = arith.constant 0 : i32
    return %arg0, %c0_i32 : i32, i32
  }
  func.func @transform_1(%arg0: i32) -> (i32, i32) {
    %c0_i32 = arith.constant 0 : i32
    %c0_i32_0 = arith.constant 0 : i32
    %c0_i32_1 = arith.constant 0 : i32
    return %c0_i32, %c0_i32_0 : i32, i32
  }
  func.func @transform_2(%arg0: i32) -> (i32, i32) {
    %c0_i32 = arith.constant 0 : i32
    %c0_i32_0 = arith.constant 0 : i32
    %c0_i32_1 = arith.constant 0 : i32
    return %c0_i32, %c0_i32_0 : i32, i32
  }
  func.func @transform_3(%arg0: i32) -> (i32, i32) {
    %c0_i32 = arith.constant 0 : i32
    %c0_i32_0 = arith.constant 0 : i32
    return %arg0, %c0_i32 : i32, i32
  }
}

</mosaic_0001>

<bundles_post_ra>
// kernel: tpu_custom_call.1
= control target key start
LH: loop header
LB: loop body
LE: loop exit
PB: predicated region body
PF: predicated region fallthrough
CT: control target
= control target key end

     0   :  { %8 = vsyncpa [#allocation3], 0  ;;  %s376_s0 = inlined_call_operand.hbm [shape: bf16[16,128], index: 0, kind: input, shape index: {}]   ;;  %s377_s1 = inlined_call_operand.hbm [shape: bf16[128,128], index: 1, kind: input, shape index: {}]   ;;  %s378_s2 = inlined_call_operand.vmem [shape: f32[1,128], index: 2, kind: input, shape index: {}]   ;;  %s379_s3 = inlined_call_operand.hbm [shape: f32[16,128], index: 3, kind: output, shape index: {}]  }
   0x1   :  { %9 = vsyncpa [#allocation6], 0 }
   0x2   :  { %10 = vsyncpa [#allocation4], 0  ;;  %s335_s12 = smov [#allocation2]  }
   0x3   :  { %s16_s13 = sshll.u32 %s335_s12, 4  ;;  %s17_s13 = int_to_ptr.vmem [resolvable:$true] %s16_s13 }
   0x4   :  { %s277_s14 = scalar_lea.vmem %s17_s13, 128  ;;  %p282_p1 = scmp.lt.s32.totalorder %s17_s13, %s17_s13 }
   0x5   :  { %p278_p0 = scmp.ne.s32.totalorder %s17_s13, %s277_s14  ;;  %p283_p2 = scmp.lt.s32.totalorder %s277_s14, %s277_s14 }
   0x7   :  { %p284_p3 = por %p283_p2, %p282_p1 }
   0x9   :  { %p285_p4 = pnand %p284_p3, %p278_p0 }
   0xb   :  { %288 = shalt.err (!%p285_p4)
}
   0xc   :  { %s336_s15 = smov 64   ;;  %s337_s16 = smov 4  }
   0xd   :  { %22 = dma.hbm_to_vmem [thread:$0]  %s376_s0, 128, %s17_s13, [#allocation3], %s336_s15, %s336_s15, %s337_s16  }
   0xe   :  { %s338_s19 = smov [#allocation5]  }
   0xf   :  { %s28_s20 = sshll.u32 %s338_s19, 4  ;;  %s29_s20 = int_to_ptr.vmem [resolvable:$true] %s28_s20 }
  0x10   :  { %s297_s21 = scalar_lea.vmem %s29_s20, 1024  ;;  %p302_p6 = scmp.lt.s32.totalorder %s29_s20, %s29_s20 }
  0x11   :  { %p298_p5 = scmp.ne.s32.totalorder %s29_s20, %s297_s21  ;;  %p303_p7 = scmp.lt.s32.totalorder %s297_s21, %s297_s21 }
  0x13   :  { %p304_p8 = por %p303_p7, %p302_p6 }
  0x15   :  { %p305_p9 = pnand %p304_p8, %p298_p5 }
  0x17   :  { %308 = shalt.err (!%p305_p9)
}
  0x18   :  { %34 = dma.hbm_to_vmem [thread:$0]  %s377_s1, 1024, %s29_s20, [#allocation6], %s336_s15, %s336_s15, %s337_s16  }
  0x19   :  { %329 = dma.done.wait [#allocation3], 128  }
  0x1a   :  { %330 = vsyncadd [#allocation3], 4294967168 }
  0x1b   :  { %331 = dma.done.wait [#allocation6], 1024  }
  0x1c   :  { %332 = vsyncadd [#allocation6], 4294966272  ;;  %v339_v0 = vmov 0.0   ;;  %vm340_vm0 = vmmov 0   ;;  %v252_v1 = vld [vmem:[#allocation5 + $0x38] sm:$0xff]   ;;  %v253_v2 = vld [vmem:[#allocation5 + $0x30] sm:$0xff]  }
  0x1d   :  { %223 = vmatprep.subr.bf16.mxu0 %v339_v0  ;;  %239 = vmatprep.mubr.msk.bf16.mxu0 %vm340_vm0, %v339_v0  ;;  %v254_v3 = vld [vmem:[#allocation5 + $0x28] sm:$0xff]   ;;  %v255_v4 = vld [vmem:[#allocation5 + $0x20] sm:$0xff]   ;;  %v256_v5 = vld [vmem:[#allocation5 + $0x18] sm:$0xff]  }
  0x1e   :  { %224 = vmatpush3.bf16.msra.mxu0 %v252_v1  ;;  %v257_v6 = vld [vmem:[#allocation5 + $0x10] sm:$0xff]   ;;  %v258_v7 = vld [vmem:[#allocation5 + $0x8] sm:$0xff]   ;;  %v259_v8 = vld [vmem:[#allocation5] sm:$0xff]  }
  0x1f   :  { %225 = vmatprep.subr.bf16.mxu0 %v339_v0  ;;  %v260_v9 = vld [vmem:[#allocation2] sm:$0xff]  }
  0x20   :  { %v204_v10 = vld [vmem:[%s378_s2] ss:$0 sm:$0xff]  ;;  %s341_s2 = smov [#allocation7]  }
  0x21   :  { %s191_s24 = sshll.u32 %s341_s2, 4  ;;  %s192_s24 = int_to_ptr.vmem [resolvable:$true] %s191_s24 }
  0x22   :  { %226 = vmatpush3.bf16.msra.mxu0 %v253_v2  ;;  %s309_s25 = scalar_lea.vmem %s192_s24, 256  ;;  %p314_p11 = scmp.lt.s32.totalorder %s192_s24, %s192_s24 }
  0x23   :  { %227 = vmatprep.subr.bf16.mxu0 %v339_v0  ;;  %p310_p10 = scmp.ne.s32.totalorder %s192_s24, %s309_s25  ;;  %p315_p12 = scmp.lt.s32.totalorder %s309_s25, %s309_s25 }
  0x25   :  { %p316_p13 = por %p315_p12, %p314_p11 }
  0x26   :  { %228 = vmatpush3.bf16.msra.mxu0 %v254_v3 }
  0x27   :  { %229 = vmatprep.subr.bf16.mxu0 %v339_v0  ;;  %p317_p0 = pnand %p316_p13, %p310_p10 }
  0x2a   :  { %230 = vmatpush3.bf16.msra.mxu0 %v255_v4 }
  0x2b   :  { %231 = vmatprep.subr.bf16.mxu0 %v339_v0 }
  0x2e   :  { %232 = vmatpush3.bf16.msra.mxu0 %v256_v5 }
  0x2f   :  { %233 = vmatprep.subr.bf16.mxu0 %v339_v0 }
  0x32   :  { %234 = vmatpush3.bf16.msra.mxu0 %v257_v6 }
  0x33   :  { %235 = vmatprep.subr.bf16.mxu0 %v339_v0 }
  0x36   :  { %236 = vmatpush3.bf16.msra.mxu0 %v258_v7 }
  0x37   :  { %237 = vmatprep.subr.bf16.mxu0 %v339_v0 }
  0x3a   :  { %238 = vmatpush3.bf16.msra.mxu0 %v259_v8 }
  0x3d   :  { %240 = vmatmul.mubr.bf16.vlgmr.msra.gmra.mxu0 %v260_v9 }
  0xfd   :  { %v157_v11 = vpop.f32.mrf.mxu0 }
  0xfe   :  { %v158_v12 = vadd.f32 %v204_v10, %v157_v11 }
  0xff   :  { %v241_v13 = vpop.f32.mrf.mxu0 }
 0x100   :  { %164 = vmax.xlane.f32.xlu0 %v158_v12 }
 0x101   :  { %v160_v14 = vpop.f32.mrf.mxu0 }
 0x102   :  { %v161_v15 = vadd.f32 %v204_v10, %v160_v14 }
 0x103   :  { %v242_v16 = vpop.f32.mrf.mxu0 }
 0x104   :  { %166 = vmax.xlane.f32.xlu0 %v161_v15 }
 0x189   :  { %v165_v17 = vpop.xlane.xlu0 %164 }
 0x18a   :  { %v168_v18 = vsub.f32 %v158_v12, %v165_v17 }
 0x18c   :  { %v170_v19 = vmul.f32 1.442695, %v168_v18 }
 0x18d   :  { %v167_v20 = vpop.xlane.xlu0 %166 }
 0x18e   :  { %v169_v21 = vsub.f32 %v161_v15, %v167_v20  ;;  %261 = vpow2.f32 %v170_v19 }
 0x190   :  { %v172_v22 = vmul.f32 1.442695, %v169_v21 }
 0x192   :  { %263 = vpow2.f32 %v172_v22 }
 0x19b   :  { %v262_v23 = vpop.eup %261 }
 0x19c   :  { %174 = vadd.xlane.f32.xlu1 %v262_v23 }
 0x19f   :  { %v264_v24 = vpop.eup %263 }
 0x1a0   :  { %176 = vadd.xlane.f32.xlu1 %v264_v24 }
 0x225   :  { %v175_v25 = vpop.xlane.xlu1 %174 }
 0x226   :  { %265 = vlog2.f32 %v175_v25 }
 0x229   :  { %v177_v26 = vpop.xlane.xlu1 %176 }
 0x22a   :  { %267 = vlog2.f32 %v177_v26 }
 0x233   :  { %v266_v27 = vpop.eup %265 }
 0x234   :  { %v179_v28 = vmul.f32 0.6931472, %v266_v27 }
 0x236   :  { %v182_v29 = vsub.f32 %v168_v18, %v179_v28 }
 0x237   :  { %v268_v30 = vpop.eup %267 }
 0x238   :  { %184 = vst [vmem:[#allocation7] sm:$0xff] %v182_v29  ;;  %v181_v31 = vmul.f32 0.6931472, %v268_v30 }
 0x23a   :  { %v183_v32 = vsub.f32 %v169_v21, %v181_v31 }
 0x23c   :  { %185 = vst [vmem:[#allocation7 + $0x8] sm:$0xff] %v183_v32 }
 0x23d   :  { %320 = shalt.err (!%p317_p0)
}
 0x23e   :  { %s342_s26 = smov 128   ;;  %s343_s27 = smov 8  }
 0x23f   :  { %197 = dma.vmem_to_hbm [thread:$0]  %s192_s24, 256, %s379_s3, [#allocation4], %s342_s26, %s342_s26, %s343_s27  }
 0x240   :  { %333 = dma.done.wait [#allocation4], 256  }
 0x241   :  { %334 = vsyncadd [#allocation4], 4294967040 }
 0x242   :  { %201 = vsyncpa [#allocation3], 1 }
 0x243   :  { %202 = vsyncpa [#allocation6], 1 }
 0x244   :  { %203 = vsyncpa [#allocation4], 1 }

</bundles_post_ra>
